<compile_context>
chip_gen: v5e
topology: v5e:2x2
jax: 0.10.0
libtpu: 0.0.40
codegen_flags: <defaults>
</compile_context>

<pallas_src>
import math

import jax
import jax.numpy as jnp
from jax.experimental import pallas as pl
from jax.experimental.pallas import tpu as pltpu

_MIB = 1 << 20


# --------------------------------------------------------------------------
# Hardware / tiling helpers
# --------------------------------------------------------------------------
def _tpu_vmem_bytes():
    """Physical VMEM per TensorCore; conservative 64 MiB fallback (v7x-sized,
    always safe) if the query is unavailable."""
    try:
        info = pltpu.get_tpu_info()
        vmem = getattr(info, "vmem_capacity_bytes", None)
        if vmem:
            return int(vmem)
    except Exception:
        pass
    return 64 * _MIB


def _largest_divisor_tile(dim, target, multiple):
    """Largest t <= target with dim % t == 0 and t % multiple == 0, else dim."""
    if dim <= target:
        return dim
    t = (target // multiple) * multiple
    while t >= multiple:
        if dim % t == 0:
            return t
        t -= multiple
    return dim


def _pick_row_tile(rows, cap_rows, block_rows, two_core_hint):
    tm = min(block_rows, rows, max(int(cap_rows), 8))
    if tm < rows:
        # MXU-friendly granularity (256 on v6e/v7x, 128 ok on v5e), min 8.
        if tm >= 256:
            tm = (tm // 256) * 256
        elif tm >= 128:
            tm = 128
        else:
            tm = max(8, (tm // 8) * 8)
    # v7x (2 TCs/chip): make sure the parallel row axis has >= 2 blocks when
    # there is enough work, so both TensorCores are used.
    if two_core_hint and tm >= rows and rows >= 512:
        tm = max(256, (((rows + 1) // 2) // 256) * 256)
    return tm


# --------------------------------------------------------------------------
# Kernels
# --------------------------------------------------------------------------
def _fused_kernel(x_ref, w_ref, b_ref, o_ref, acc_ref):
    # x_ref: (tm, tk); w_ref: (tk, vocab); b_ref: (1, vocab) f32
    # o_ref: (tm, vocab); acc_ref: (tm, vocab) f32
    k = pl.program_id(1)

    @pl.when(k == 0)
    def _():
        # Fold the bias into the accumulator init (saves an epilogue add).
        acc_ref[...] = jnp.broadcast_to(
            b_ref[...].astype(jnp.float32), acc_ref.shape)

    acc_ref[...] += jnp.dot(x_ref[...], w_ref[...],
                            preferred_element_type=jnp.float32)

    @pl.when(k == pl.num_programs(1) - 1)
    def _():
        # In-place epilogue: keep at most one extra (tm, vocab) live value.
        m = jnp.max(acc_ref[...], axis=-1, keepdims=True)
        acc_ref[...] = acc_ref[...] - m
        lse = jnp.log(jnp.sum(jnp.exp(acc_ref[...]), axis=-1, keepdims=True))
        o_ref[...] = (acc_ref[...] - lse).astype(o_ref.dtype)


def _logits_lse_kernel(x_ref, w_ref, b_ref, logits_ref, lse_ref,
                       acc_ref, m_ref, l_ref):
    # Grid (i rows, j vocab tiles, k reduction). Writes f32 logits tiles and
    # an online per-row logsumexp (finalized at the last vocab tile).
    j = pl.program_id(1)
    k = pl.program_id(2)
    last_j = pl.num_programs(1) - 1
    last_k = pl.num_programs(2) - 1

    @pl.when(jnp.logical_and(j == 0, k == 0))
    def _():
        m_ref[...] = jnp.full_like(m_ref, -jnp.inf)
        l_ref[...] = jnp.zeros_like(l_ref)

    @pl.when(k == 0)
    def _():
        acc_ref[...] = jnp.broadcast_to(
            b_ref[...].astype(jnp.float32), acc_ref.shape)

    acc_ref[...] += jnp.dot(x_ref[...], w_ref[...],
                            preferred_element_type=jnp.float32)

    @pl.when(k == last_k)
    def _():
        logits = acc_ref[...]
        logits_ref[...] = logits
        m_new = jnp.maximum(m_ref[...], jnp.max(logits, axis=-1, keepdims=True))
        l_ref[...] = (l_ref[...] * jnp.exp(m_ref[...] - m_new)
                      + jnp.sum(jnp.exp(logits - m_new), axis=-1, keepdims=True))
        m_ref[...] = m_new

    @pl.when(jnp.logical_and(j == last_j, k == last_k))
    def _():
        lse_ref[...] = m_ref[...] + jnp.log(l_ref[...])


def _normalize_kernel(logits_ref, lse_ref, o_ref):
    o_ref[...] = (logits_ref[...] - lse_ref[...]).astype(o_ref.dtype)


# --------------------------------------------------------------------------
# Wrappers
# --------------------------------------------------------------------------
def prepare_generator_params(weight, bias, compute_dtype=jnp.bfloat16):
    """One-time weight prep (do at load/init time, NOT per forward call):
    transpose the nn.Linear weight (vocab, d_model) -> (d_model, vocab)
    (lane-dense output dim) and cast to the MXU streaming dtype."""
    w_t = jnp.asarray(weight).T.astype(compute_dtype)
    b = jnp.asarray(bias).astype(jnp.float32).reshape(1, -1)
    return w_t, b


def generator_forward(x, w_t, bias, *,
                      compute_dtype=None,
                      block_rows=1024, block_k=512, block_vocab=2048,
                      force_vocab_tiled=False):
    """log_softmax(x @ w_t + bias, axis=-1).

    w_t: pre-transposed weight, shape (d_model, vocab) — see
    prepare_generator_params. bias: (vocab,) or (1, vocab).
    """
    orig_shape = x.shape
    d_model = orig_shape[-1]
    assert w_t.shape[0] == d_model, "w_t must be (d_model, vocab)"
    vocab = w_t.shape[1]
    rows = int(math.prod(orig_shape[:-1])) if len(orig_shape) > 1 else 1

    if compute_dtype is None:
        compute_dtype = w_t.dtype
    x2 = x.reshape(rows, d_model).astype(compute_dtype)
    wt = w_t.astype(compute_dtype)
    b2 = jnp.asarray(bias).astype(jnp.float32).reshape(1, vocab)

    in_bytes = jnp.dtype(compute_dtype).itemsize
    out_bytes = jnp.dtype(x.dtype).itemsize

    # ---- generation-aware VMEM limit / tiling budget ----
    phys_vmem = _tpu_vmem_bytes()
    vmem_limit = max(32 * _MIB, min(phys_vmem - 8 * _MIB, 112 * _MIB))
    budget = max(16 * _MIB, vmem_limit - 8 * _MIB)  # compiler scratch headroom
    two_core_hint = phys_vmem <= 64 * _MIB          # v7x-like part

    # ---- K tile: largest 128-multiple divisor of d_model <= block_k ----
    tk = _largest_divisor_tile(d_model, block_k, 128)
    n_k = pl.cdiv(d_model, tk)

    compiler_params = pltpu.CompilerParams(
        dimension_semantics=None,  # set per call below
        vmem_limit_bytes=int(vmem_limit),
    )

    # ---- path A feasibility: full vocab resident per row block ----
    # fixed: double-buffered W tile + bias; per row: 2x x, 2x out, f32 acc,
    # + 2 (tm, vocab) f32 allowance for epilogue temporaries.
    fused_fixed = 2 * tk * vocab * in_bytes + 2 * vocab * 4
    fused_per_row = (2 * tk * in_bytes + 2 * vocab * out_bytes
                     + vocab * 4 + 2 * vocab * 4)
    fused_avail = budget - fused_fixed
    fused_tm_cap = fused_avail // fused_per_row if fused_avail > 0 else 0
    use_fused = ((not force_vocab_tiled)
                 and fused_fixed <= budget
                 and fused_tm_cap >= min(rows, 128))

    if use_fused:
        tm = _pick_row_tile(rows, fused_tm_cap, block_rows, two_core_hint)
        grid = (pl.cdiv(rows, tm), n_k)
        out = pl.pallas_call(
            _fused_kernel,
            out_shape=jax.ShapeDtypeStruct((rows, vocab), x.dtype),
            grid_spec=pltpu.PrefetchScalarGridSpec(
                num_scalar_prefetch=0,
                grid=grid,
                in_specs=[
                    pl.BlockSpec((tm, tk), lambda i, k: (i, k)),
                    pl.BlockSpec((tk, vocab), lambda i, k: (k, 0)),
                    pl.BlockSpec((1, vocab), lambda i, k: (0, 0)),
                ],
                out_specs=pl.BlockSpec((tm, vocab), lambda i, k: (i, 0)),
                scratch_shapes=[pltpu.VMEM((tm, vocab), jnp.float32)],
            ),
            compiler_params=pltpu.CompilerParams(
                dimension_semantics=("parallel", "arbitrary"),
                vmem_limit_bytes=int(vmem_limit),
            ),
        )(x2, wt, b2)
        return out.reshape(*orig_shape[:-1], vocab)

    # ---- path B: vocab-tiled two-pass (large vocab / small VMEM) ----
    tv = _largest_divisor_tile(vocab, block_vocab, 128)
    tiled_fixed = 2 * tk * tv * in_bytes + 2 * tv * 4
    tiled_per_row = (2 * tk * in_bytes   # x (double-buffered)
                     + 2 * tv * 4        # f32 logits out (double-buffered)
                     + tv * 4            # f32 acc
                     + tv * 4            # epilogue temp allowance
                     + 4 * 4)            # m, l, lse (tiny)
    tiled_avail = budget - tiled_fixed
    tiled_tm_cap = tiled_avail // tiled_per_row if tiled_avail > 0 else 8
    tm = _pick_row_tile(rows, tiled_tm_cap, block_rows, two_core_hint)

    grid1 = (pl.cdiv(rows, tm), vocab // tv, n_k)
    logits, lse = pl.pallas_call(
        _logits_lse_kernel,
        out_shape=(jax.ShapeDtypeStruct((rows, vocab), jnp.float32),
                   jax.ShapeDtypeStruct((rows, 1), jnp.float32)),
        grid_spec=pltpu.PrefetchScalarGridSpec(
            num_scalar_prefetch=0,
            grid=grid1,
            in_specs=[
                pl.BlockSpec((tm, tk), lambda i, j, k: (i, k)),
                pl.BlockSpec((tk, tv), lambda i, j, k: (k, j)),
                pl.BlockSpec((1, tv), lambda i, j, k: (0, j)),
            ],
            out_specs=[
                pl.BlockSpec((tm, tv), lambda i, j, k: (i, j)),
                pl.BlockSpec((tm, 1), lambda i, j, k: (i, 0)),
            ],
            scratch_shapes=[
                pltpu.VMEM((tm, tv), jnp.float32),
                pltpu.VMEM((tm, 1), jnp.float32),
                pltpu.VMEM((tm, 1), jnp.float32),
            ],
        ),
        compiler_params=pltpu.CompilerParams(
            dimension_semantics=("parallel", "arbitrary", "arbitrary"),
            vmem_limit_bytes=int(vmem_limit),
        ),
    )(x2, wt, b2)

    grid2 = (pl.cdiv(rows, tm), vocab // tv)
    out = pl.pallas_call(
        _normalize_kernel,
        out_shape=jax.ShapeDtypeStruct((rows, vocab), x.dtype),
        grid_spec=pltpu.PrefetchScalarGridSpec(
            num_scalar_prefetch=0,
            grid=grid2,
            in_specs=[
                pl.BlockSpec((tm, tv), lambda i, j: (i, j)),
                pl.BlockSpec((tm, 1), lambda i, j: (i, 0)),
            ],
            out_specs=pl.BlockSpec((tm, tv), lambda i, j: (i, j)),
        ),
        compiler_params=pltpu.CompilerParams(
            dimension_semantics=("parallel", "parallel"),
            vmem_limit_bytes=int(vmem_limit),
        ),
    )(logits, lse)
    return out.reshape(*orig_shape[:-1], vocab)


def generator_ref(x, weight, bias):
    """Pure-JAX reference mirroring the PyTorch module (weight: (vocab, d_model))."""
    logits = jnp.dot(x, weight.T) + bias
    return jax.nn.log_softmax(logits, axis=-1)


# --------------------------------------------------------------------------
# Self-test
# --------------------------------------------------------------------------
if __name__ == "__main__":
    root = jax.random.PRNGKey(0)
    key1, key2 = jax.random.split(root)

    def make_inputs(key, batch, seq, d_model, vocab):
        kx, kw, kb = jax.random.split(key, 3)
        x = jax.random.normal(kx, (batch, seq, d_model), dtype=jnp.float32)
        # nn.Linear default init: U(-1/sqrt(in_features), 1/sqrt(in_features))
        bound = 1.0 / math.sqrt(d_model)
        weight = jax.random.uniform(kw, (vocab, d_model), jnp.float32, -bound, bound)
        bias = jax.random.uniform(kb, (vocab,), jnp.float32, -bound, bound)
        return x, weight, bias

    # 1) fused path, f32 compute (tight tolerance), spec-sized shapes.
    x, weight, bias = make_inputs(key1, 2, 8, 32, 128)
    w_t, b = prepare_generator_params(weight, bias, compute_dtype=jnp.float32)
    out = jax.block_until_ready(generator_forward(x, w_t, b))
    ref = generator_ref(x, weight, bias)
    assert out.shape == (2, 8, 128) and out.dtype == x.dtype
    assert jnp.allclose(out, ref, atol=1e-3, rtol=1e-3), "fused f32 mismatch"

    # 2) fused path, bf16 weight/activation streaming with a K-split.
    x2, weight2, bias2 = make_inputs(key2, 2, 8, 256, 256)
    w_t2, b2 = prepare_generator_params(weight2, bias2)  # bf16
    out2 = jax.block_until_ready(generator_forward(x2, w_t2, b2, block_k=128))
    ref2 = generator_ref(x2, weight2, bias2)
    assert jnp.allclose(out2, ref2, atol=2e-2, rtol=2e-2), "fused bf16 mismatch"

    # 3) vocab-tiled two-pass path, forced at small shapes (exercises the
    #    online-logsumexp + normalize kernels used for large vocab).
    out3 = jax.block_until_ready(
        generator_forward(x2, w_t2, b2, block_k=128, block_vocab=128,
                          force_vocab_tiled=True))
    assert jnp.allclose(out3, ref2, atol=2e-2, rtol=2e-2), "tiled path mismatch"

    print("KERNEL_OK")
</pallas_src>

<mosaic_0001>
module attributes {stable_mosaic.version = 11 : i64} {
  func.func @_fused_kernel(%arg0: i32, %arg1: i32, %arg2: memref<16x32xf32, #tpu.memory_space<vmem>>, %arg3: memref<32x128xf32, #tpu.memory_space<vmem>>, %arg4: memref<1x128xf32, #tpu.memory_space<vmem>>, %arg5: memref<16x128xf32, #tpu.memory_space<vmem>>, %arg6: memref<16x128xf32, #tpu.memory_space<vmem>>) attributes {dimension_semantics = [#tpu.dimension_semantics<parallel>, #tpu.dimension_semantics<arbitrary>], iteration_bounds = array<i64: 1, 1>, scalar_prefetch = 0 : i64, scratch_operands = 1 : i64, tpu.core_type = #tpu.core_type<tc>, window_params = [{transform_indices = @transform_0, window_bounds = array<i64: 16, 32>}, {transform_indices = @transform_1, window_bounds = array<i64: 32, 128>}, {pipeline_mode = #tpu.pipeline_mode<synchronous>, transform_indices = @transform_2, window_bounds = array<i64: 1, 128>}, {transform_indices = @transform_3, window_bounds = array<i64: 16, 128>}]} {
    %c0_i32 = arith.constant 0 : i32
    %0 = arith.cmpi eq, %arg1, %c0_i32 : i32
    %1 = arith.extui %0 : i1 to i32
    %c0_i32_0 = arith.constant 0 : i32
    %2 = arith.cmpi ne, %1, %c0_i32_0 : i32
    scf.if %2 {
      %c0_10 = arith.constant 0 : index
      %c0_11 = arith.constant 0 : index
      %12 = vector.load %arg4[%c0_10, %c0_11] : memref<1x128xf32, #tpu.memory_space<vmem>>, vector<1x128xf32>
      %13 = vector.shape_cast %12 : vector<1x128xf32> to vector<1x128xf32>
      %14 = vector.broadcast %13 : vector<1x128xf32> to vector<16x128xf32>
      %c0_12 = arith.constant 0 : index
      %c0_13 = arith.constant 0 : index
      %15 = vector.load %arg6[%c0_12, %c0_13] : memref<16x128xf32, #tpu.memory_space<vmem>>, vector<16x128xf32>
      tpu.vector_store %arg6[%c0_12, %c0_13], %14 {strides = array<i32>} : memref<16x128xf32, #tpu.memory_space<vmem>>, vector<16x128xf32>,
    } else {
    }
    %c0 = arith.constant 0 : index
    %c0_1 = arith.constant 0 : index
    %3 = vector.load %arg6[%c0, %c0_1] : memref<16x128xf32, #tpu.memory_space<vmem>>, vector<16x128xf32>
    %c0_2 = arith.constant 0 : index
    %c0_3 = arith.constant 0 : index
    %4 = vector.load %arg2[%c0_2, %c0_3] : memref<16x32xf32, #tpu.memory_space<vmem>>, vector<16x32xf32>
    %c0_4 = arith.constant 0 : index
    %c0_5 = arith.constant 0 : index
    %5 = vector.load %arg3[%c0_4, %c0_5] : memref<32x128xf32, #tpu.memory_space<vmem>>, vector<32x128xf32>
    %cst = arith.constant dense<0.000000e+00> : vector<16x128xf32>
    %6 = tpu.matmul %4, %5, %cst {dimension_numbers = #tpu.dot_dimension_numbers<[1], [0], [0], [1], [0, 0, 1, 1], [], []>} : vector<16x32xf32>, vector<32x128xf32>, vector<16x128xf32> -> vector<16x128xf32>
    %7 = arith.addf %3, %6 : vector<16x128xf32>
    %c0_6 = arith.constant 0 : index
    %c0_7 = arith.constant 0 : index
    %8 = vector.load %arg6[%c0_6, %c0_7] : memref<16x128xf32, #tpu.memory_space<vmem>>, vector<16x128xf32>
    tpu.vector_store %arg6[%c0_6, %c0_7], %7 {strides = array<i32>} : memref<16x128xf32, #tpu.memory_space<vmem>>, vector<16x128xf32>,
    %c0_i32_8 = arith.constant 0 : i32
    %9 = arith.cmpi eq, %arg1, %c0_i32_8 : i32
    %10 = arith.extui %9 : i1 to i32
    %c0_i32_9 = arith.constant 0 : i32
    %11 = arith.cmpi ne, %10, %c0_i32_9 : i32
    scf.if %11 {
      %c0_10 = arith.constant 0 : index
      %c0_11 = arith.constant 0 : index
      %12 = vector.load %arg6[%c0_10, %c0_11] : memref<16x128xf32, #tpu.memory_space<vmem>>, vector<16x128xf32>
      %cst_12 = arith.constant dense<0xFF800000> : vector<16xf32>
      %13 = vector.multi_reduction <maximumf>, %12, %cst_12 [1] : vector<16x128xf32> to vector<16xf32>
      %14 = vector.shape_cast %13 : vector<16xf32> to vector<16x1xf32>
      %c0_13 = arith.constant 0 : index
      %c0_14 = arith.constant 0 : index
      %15 = vector.load %arg6[%c0_13, %c0_14] : memref<16x128xf32, #tpu.memory_space<vmem>>, vector<16x128xf32>
      %16 = vector.broadcast %14 : vector<16x1xf32> to vector<16x128xf32>
      %17 = arith.subf %15, %16 : vector<16x128xf32>
      %c0_15 = arith.constant 0 : index
      %c0_16 = arith.constant 0 : index
      %18 = vector.load %arg6[%c0_15, %c0_16] : memref<16x128xf32, #tpu.memory_space<vmem>>, vector<16x128xf32>
      tpu.vector_store %arg6[%c0_15, %c0_16], %17 {strides = array<i32>} : memref<16x128xf32, #tpu.memory_space<vmem>>, vector<16x128xf32>,
      %c0_17 = arith.constant 0 : index
      %c0_18 = arith.constant 0 : index
      %19 = vector.load %arg6[%c0_17, %c0_18] : memref<16x128xf32, #tpu.memory_space<vmem>>, vector<16x128xf32>
      %20 = math.exp %19 : vector<16x128xf32>
      %cst_19 = arith.constant dense<0.000000e+00> : vector<16xf32>
      %21 = vector.multi_reduction <add>, %20, %cst_19 [1] : vector<16x128xf32> to vector<16xf32>
      %22 = vector.shape_cast %21 : vector<16xf32> to vector<16x1xf32>
      %23 = math.log %22 : vector<16x1xf32>
      %c0_20 = arith.constant 0 : index
      %c0_21 = arith.constant 0 : index
      %24 = vector.load %arg6[%c0_20, %c0_21] : memref<16x128xf32, #tpu.memory_space<vmem>>, vector<16x128xf32>
      %25 = vector.broadcast %23 : vector<16x1xf32> to vector<16x128xf32>
      %26 = arith.subf %24, %25 : vector<16x128xf32>
      %c0_22 = arith.constant 0 : index
      %c0_23 = arith.constant 0 : index
      %27 = vector.load %arg5[%c0_22, %c0_23] : memref<16x128xf32, #tpu.memory_space<vmem>>, vector<16x128xf32>
      tpu.vector_store %arg5[%c0_22, %c0_23], %26 {strides = array<i32>} : memref<16x128xf32, #tpu.memory_space<vmem>>, vector<16x128xf32>,
    } else {
    }
    return
  }
  func.func @transform_0(%arg0: i32, %arg1: i32) -> (i32, i32) {
    %c0_i32 = arith.constant 0 : i32
    return %arg0, %arg1 : i32, i32
  }
  func.func @transform_1(%arg0: i32, %arg1: i32) -> (i32, i32) {
    %c0_i32 = arith.constant 0 : i32
    %c0_i32_0 = arith.constant 0 : i32
    return %arg1, %c0_i32 : i32, i32
  }
  func.func @transform_2(%arg0: i32, %arg1: i32) -> (i32, i32) {
    %c0_i32 = arith.constant 0 : i32
    %c0_i32_0 = arith.constant 0 : i32
    %c0_i32_1 = arith.constant 0 : i32
    return %c0_i32, %c0_i32_0 : i32, i32
  }
  func.func @transform_3(%arg0: i32, %arg1: i32) -> (i32, i32) {
    %c0_i32 = arith.constant 0 : i32
    %c0_i32_0 = arith.constant 0 : i32
    return %arg0, %c0_i32 : i32, i32
  }
}

</mosaic_0001>

<bundles_post_ra>
// kernel: tpu_custom_call.1
= control target key start
LH: loop header
LB: loop body
LE: loop exit
PB: predicated region body
PF: predicated region fallthrough
CT: control target
= control target key end

     0   :  { %8 = vsyncpa [#allocation4], 0  ;;  %s294_s0 = inlined_call_operand.hbm [shape: f32[16,32], index: 0, kind: input, shape index: {}]   ;;  %s295_s1 = inlined_call_operand.hbm [shape: f32[32,128], index: 1, kind: input, shape index: {}]   ;;  %s296_s2 = inlined_call_operand.vmem [shape: f32[1,128], index: 2, kind: input, shape index: {}]   ;;  %s297_s3 = inlined_call_operand.hbm [shape: f32[16,128], index: 3, kind: output, shape index: {}]  }
   0x1   :  { %9 = vsyncpa [#allocation7], 0 }
   0x2   :  { %10 = vsyncpa [#allocation5], 0  ;;  %s15_s14 = sshll.u32 %s294_s0, 4  ;;  %s248_s15 = smov [#allocation3]   ;;  %s16_s14 = int_to_ptr.hbm [resolvable:$true] %s15_s14 }
   0x3   :  { %s17_s16 = sshll.u32 %s248_s15, 4  ;;  %s28_s19 = sshll.u32 %s295_s1, 4  ;;  %s18_s16 = int_to_ptr.vmem [resolvable:$true] %s17_s16  ;;  %s29_s19 = int_to_ptr.hbm [resolvable:$true] %s28_s19 }
   0x4   :  { %s249_s20 = smov 128   ;;  %s250_s21 = smov 8  }
   0x5   :  { %23 = dma.hbm_to_vmem [thread:$0]  %s16_s14, 256, %s18_s16, [#allocation4], %s249_s20, %s249_s20, %s250_s21  }
   0x6   :  { %s251_s22 = smov [#allocation6]  }
   0x7   :  { %s30_s23 = sshll.u32 %s251_s22, 4  ;;  %s31_s23 = int_to_ptr.vmem [resolvable:$true] %s30_s23 }
   0x8   :  { %36 = dma.hbm_to_vmem [thread:$0]  %s29_s19, 512, %s31_s23, [#allocation7], %s249_s20, %s249_s20, %s250_s21  }
   0x9   :  { %242 = dma.done.wait [#allocation4], 256  }
   0xa   :  { %243 = vsyncadd [#allocation4], 4294967040 }
   0xb   :  { %244 = dma.done.wait [#allocation7], 512  }
   0xc   :  { %245 = vsyncadd [#allocation7], 4294966784  ;;  %v64_v0 = vld [vmem:[#allocation6 + $0x18] sm:$0xff]  ;;  %v63_v1 = vld [vmem:[#allocation6 + $0x10] sm:$0xff]  ;;  %vm65_vm0 = vcmask 261120   ;;  %s136_s27 = sshll.u32 %s297_s3, 4  ;;  %s137_s27 = int_to_ptr.hbm [resolvable:$true] %s136_s27 }
   0xd   :  { %84 = vmatpush.msra.mxu0 %v64_v0  ;;  %152 = vmatpush.msra.mxu1 %v64_v0  ;;  %v62_v2 = vld [vmem:[#allocation6 + $0x8] sm:$0xff]  ;;  %v61_v3 = vld [vmem:[#allocation6] sm:$0xff]  ;;  %v59_v4 = vld [vmem:[#allocation3] sm:$0xff] }
   0xe   :  { %v60_v5 = vld [vmem:[#allocation3 + $0x8] sm:$0xff]  ;;  %v161_v6 = vld [vmem:[%s296_s2] ss:$0 sm:$0xff]  ;;  %s252_s2 = smov [#allocation8]  }
   0xf   :  { %85 = vmatpush.msra.mxu0 %v63_v1  ;;  %153 = vmatpush.msra.mxu1 %v63_v1  ;;  %s134_s24 = sshll.u32 %s252_s2, 4  ;;  %s135_s24 = int_to_ptr.vmem [resolvable:$true] %s134_s24 }
  0x11   :  { %86 = vmatpush.msra.mxu0 %v62_v2  ;;  %154 = vmatpush.msra.mxu1 %v62_v2 }
  0x13   :  { %87 = vmatpush.msra.mxu0 %v61_v3  ;;  %155 = vmatpush.msra.mxu1 %v61_v3 }
  0x14   :  { %150 = vmatmul.msk.f32.vlgmr.msra.gmra.mxu0 %vm65_vm0, %v59_v4  ;;  %151 = vmatmul.msk.f32.vlgmr.msra.gmra.mxu1 %vm65_vm0, %v60_v5 }
  0x91   :  { %v89_v7 = vpop.f32.mrf.mxu0  ;;  %v92_v9 = vpop.f32.mrf.mxu1 }
  0x92   :  { %v95_v8 = vadd.f32 %v161_v6, %v89_v7  ;;  %v96_v10 = vadd.f32 %v161_v6, %v92_v9 }
  0x94   :  { %104 = vmax.xlane.f32.xlu0 %v95_v8 }
  0x9c   :  { %106 = vmax.xlane.f32.xlu0 %v96_v10 }
 0x107   :  { %v105_v11 = vpop.xlane.xlu0 %104 }
 0x108   :  { %v108_v12 = vsub.f32 %v95_v8, %v105_v11 }
 0x10a   :  { %v114_v13 = vmul.f32 1.442695, %v108_v12 }
 0x10c   :  { %162 = vpow2.f32 %v114_v13 }
 0x10f   :  { %v107_v14 = vpop.xlane.xlu0 %106 }
 0x110   :  { %v109_v15 = vsub.f32 %v96_v10, %v107_v14 }
 0x112   :  { %v163_v16 = vpop.eup %162  ;;  %v116_v17 = vmul.f32 1.442695, %v109_v15 }
 0x113   :  { %118 = vadd.xlane.f32.xlu1 %v163_v16 }
 0x114   :  { %164 = vpow2.f32 %v116_v17 }
 0x11a   :  { %v165_v18 = vpop.eup %164 }
 0x11b   :  { %120 = vadd.xlane.f32.xlu1 %v165_v18 }
 0x186   :  { %v119_v19 = vpop.xlane.xlu1 %118 }
 0x187   :  { %166 = vlog2.f32 %v119_v19 }
 0x18d   :  { %v167_v20 = vpop.eup %166 }
 0x18e   :  { %v123_v21 = vmul.f32 0.6931472, %v167_v20  ;;  %v121_v22 = vpop.xlane.xlu1 %120 }
 0x18f   :  { %168 = vlog2.f32 %v121_v22 }
 0x190   :  { %v126_v23 = vsub.f32 %v108_v12, %v123_v21 }
 0x192   :  { %128 = vst [vmem:[#allocation8] sm:$0xff] %v126_v23 }
 0x195   :  { %v169_v24 = vpop.eup %168 }
 0x196   :  { %v125_v25 = vmul.f32 0.6931472, %v169_v24 }
 0x198   :  { %v127_v26 = vsub.f32 %v109_v15, %v125_v25 }
 0x19a   :  { %129 = vst [vmem:[#allocation8 + $0x8] sm:$0xff] %v127_v26 }
 0x19b   :  { %142 = dma.vmem_to_hbm [thread:$0]  %s135_s24, 256, %s137_s27, [#allocation5], %s249_s20, %s249_s20, %s250_s21  }
 0x19c   :  { %246 = dma.done.wait [#allocation5], 256  }
 0x19d   :  { %247 = vsyncadd [#allocation5], 4294967040 }
 0x19e   :  { %147 = vsyncpa [#allocation4], 1 }
 0x19f   :  { %148 = vsyncpa [#allocation7], 1 }
 0x1a0   :  { %149 = vsyncpa [#allocation5], 1 }

</bundles_post_ra>
